<compile_context>
chip_gen: v7x
topology: tpu7x:2x2x1
jax: 0.10.0
libtpu: 0.0.40
codegen_flags: <defaults>
</compile_context>

<pallas_src>
from typing import NamedTuple

import jax
import jax.numpy as jnp
from jax.experimental import pallas as pl
from jax.experimental.pallas import tpu as pltpu

_EPS = 1e-12  # torch F.normalize eps (clamp on the norm)


def _cdiv(a, b):
    return -(-a // b)


def _round_up(x, m):
    return ((x + m - 1) // m) * m


# ----------------------------------------------------------------------------
# Kernel: pure MXU matmul on the pre-normalized bank tile.
# ----------------------------------------------------------------------------
def _bank_matmul_kernel(q_ref, bank_ref, out_ref):
    # The bank tile arrives already L2-normalized (and possibly bf16) from
    # prepare_adversarial_bank, so there is no per-tile square/reduce/rsqrt or
    # dtype cast left here — just the MXU matmul with f32 accumulation.
    out_ref[...] = jnp.dot(
        q_ref[...], bank_ref[...], preferred_element_type=jnp.float32
    ).astype(out_ref.dtype)


# ----------------------------------------------------------------------------
# Once-per-parameter-update preprocessing.
# ----------------------------------------------------------------------------
class PreparedBank(NamedTuple):
    bank: jax.Array   # [C, K_padded], per-column L2-normalized, storage_dtype
    k: int            # original bank_size
    tile_k: int       # lane-dense K tile consumed by the kernel


def prepare_adversarial_bank(adversarial_samples, *, storage_dtype=jnp.float32,
                             bank_tile_bytes=2 << 20):
    """Normalize, (optionally) downcast, and pad the bank ONCE per update.

    * per-column norms are computed in f32 *before* any downcast,
    * bf16 storage is an explicit opt-in (halves the dominant HBM read; the
      f32 default matches the torch module's forward numerics),
    * K is padded once (zero columns -> zero logits, sliced off later) so the
      per-forward kernel never re-pads the bank.

    Cache the result across forward calls; re-run only when the parameter
    changes.
    """
    c, k = adversarial_samples.shape
    s32 = adversarial_samples.astype(jnp.float32)
    norm = jnp.maximum(jnp.sqrt(jnp.sum(s32 * s32, axis=0, keepdims=True)), _EPS)
    bank = (s32 / norm).astype(storage_dtype)

    itemsize = jnp.dtype(storage_dtype).itemsize
    # C-aware lane-dense tile: target ~bank_tile_bytes per buffer, multiple of
    # 128 lanes, capped so small-C banks don't create huge output tiles.
    tn_cap = max(128, min(((bank_tile_bytes // (itemsize * c)) // 128) * 128, 2048))
    if k <= tn_cap:
        # Single full-extent tile; legal even when K % 128 != 0, no padding.
        return PreparedBank(bank=bank, k=k, tile_k=k)

    k128 = _round_up(k, 128)
    n_tiles = _cdiv(k128, tn_cap)
    tn = _round_up(_cdiv(k128, n_tiles), 128)   # balance tiles, minimize padding
    k_padded = tn * n_tiles
    if k_padded != k:
        bank = jnp.pad(bank, ((0, 0), (0, k_padded - k)))   # once per update
    return PreparedBank(bank=bank, k=k, tile_k=tn)


def _choose_row_tile(n, c, itemsize, *, target_bytes=1 << 20, cap=512):
    """Row (batch) tile: full N when small, else a multiple-of-8 divisor of N."""
    rows = min(cap, max(8, ((target_bytes // max(1, c * itemsize)) // 8) * 8))
    if n <= rows:
        return n                      # full-extent block is always layout-legal
    for tm in range(rows, 7, -8):
        if n % tm == 0:
            return tm
    # TODO(synk): pad/mask ragged large batch sizes instead of keeping q resident.
    return n


# ----------------------------------------------------------------------------
# Forward (matmul against a prepared bank) + torch-interface convenience.
# ----------------------------------------------------------------------------
def adversarial_set_matmul(q, prepared: PreparedBank, *, out_dtype=None):
    """l_neg[N, K] = q[N, C] @ normalized_bank[C, K] via a tiled MXU kernel."""
    n, c = q.shape
    bank = prepared.bank
    cb, k_padded = bank.shape
    assert c == cb, "q feature dim must match adversarial_samples dim"
    out_dtype = out_dtype or q.dtype

    # Keep both MXU operands in the bank's storage dtype.  With the f32 default
    # this is a no-op; with the bf16 opt-in q is rounded too (documented).
    if q.dtype != bank.dtype:
        q = q.astype(bank.dtype)

    tn = prepared.tile_k
    tm = _choose_row_tile(n, c, jnp.dtype(bank.dtype).itemsize)
    grid = (n // tm, k_padded // tn)

    out = pl.pallas_call(
        _bank_matmul_kernel,
        out_shape=jax.ShapeDtypeStruct((n, k_padded), out_dtype),
        grid=grid,
        in_specs=[
            pl.BlockSpec((tm, c), lambda i, j: (i, 0)),   # q row tile, resident over K
            pl.BlockSpec((c, tn), lambda i, j: (0, j)),   # bank tile, lane-dense K
        ],
        out_specs=pl.BlockSpec((tm, tn), lambda i, j: (i, j)),
        compiler_params=pltpu.CompilerParams(
            # Independent output tiles on both axes -> shardable across v7x's
            # two TensorCores; neutral on single-TC v5e/v6e.
            dimension_semantics=("parallel", "parallel"),
            # Tiles are sized to <= ~12 MiB total (double-buffered); 32 MiB
            # covers them with headroom even on v5e (16 MiB scoped default)
            # and stays well under v7x's 64 MiB physical VMEM.
            vmem_limit_bytes=32 * 1024 * 1024,
        ),
    )(q, bank)

    return out if prepared.k == k_padded else out[:, :prepared.k]


def adversarial_set_forward(q, adversarial_samples, update_memory=True, *,
                            storage_dtype=jnp.float32, out_dtype=None):
    """Drop-in for AdversarialSet.forward: q @ F.normalize(samples, dim=0).

    `update_memory` only changes autograd behaviour in torch (detach/no_grad/
    clone); forward values are identical, so it is accepted and ignored.
    For repeated forwards between parameter updates, call
    prepare_adversarial_bank() once and use adversarial_set_matmul() directly.
    """
    del update_memory
    prepared = prepare_adversarial_bank(adversarial_samples,
                                        storage_dtype=storage_dtype)
    return adversarial_set_matmul(q, prepared, out_dtype=out_dtype)


# ----------------------------------------------------------------------------
# Reference + self-test.
# ----------------------------------------------------------------------------
def _reference(q, samples):
    norm = jnp.maximum(jnp.sqrt(jnp.sum(samples * samples, axis=0, keepdims=True)), _EPS)
    return q @ (samples / norm)


if __name__ == "__main__":
    key = jax.random.PRNGKey(0)
    k_param, k_q, k_param2, k_q2 = jax.random.split(key, 4)

    # 1) Module-consistent small shapes: dim=128, bank_size=8, batch N=8.
    #    Default path is f32 storage/compute -> exact torch forward semantics.
    dim, bank_size, n = 128, 8, 8
    samples = jax.random.normal(k_param, (dim, bank_size), dtype=jnp.float32)
    q = jax.random.normal(k_q, (n, dim), dtype=jnp.float32)

    l_neg = adversarial_set_forward(q, samples, update_memory=True)
    jax.block_until_ready(l_neg)
    ref = _reference(q, samples)
    assert l_neg.shape == (n, bank_size)
    assert jnp.allclose(l_neg, ref, atol=1e-5, rtol=1e-5)

    # 2) Explicit bf16 opt-in (halves the dominant bank read; looser tolerance).
    prepared_bf16 = prepare_adversarial_bank(samples, storage_dtype=jnp.bfloat16)
    l_bf16 = adversarial_set_matmul(q, prepared_bf16)
    jax.block_until_ready(l_bf16)
    assert jnp.allclose(l_bf16, ref, atol=5e-2, rtol=5e-2)

    # 3) Multi-tile + ragged-K path (small bank_tile_bytes forces K tiling/pad).
    dim2, bank2, n2 = 128, 300, 16
    samples2 = jax.random.normal(k_param2, (dim2, bank2), dtype=jnp.float32)
    q2 = jax.random.normal(k_q2, (n2, dim2), dtype=jnp.float32)
    prepared2 = prepare_adversarial_bank(samples2, bank_tile_bytes=128 * 128 * 4)
    l2 = adversarial_set_matmul(q2, prepared2)
    jax.block_until_ready(l2)
    ref2 = _reference(q2, samples2)
    assert l2.shape == (n2, bank2)
    assert jnp.allclose(l2, ref2, atol=1e-5, rtol=1e-5)

    print("KERNEL_OK")
</pallas_src>

<mosaic_0001>
module attributes {stable_mosaic.version = 11 : i64} {
  func.func @_bank_matmul_kernel(%arg0: i32, %arg1: i32, %arg2: memref<8x128xf32, #tpu.memory_space<vmem>>, %arg3: memref<128x8xf32, #tpu.memory_space<vmem>>, %arg4: memref<8x8xf32, #tpu.memory_space<vmem>>) attributes {dimension_semantics = [#tpu.dimension_semantics<parallel>, #tpu.dimension_semantics<parallel>], iteration_bounds = array<i64: 1, 1>, scalar_prefetch = 0 : i64, scratch_operands = 0 : i64, tpu.core_type = #tpu.core_type<tc>, window_params = [{transform_indices = @transform_0, window_bounds = array<i64: 8, 128>}, {transform_indices = @transform_1, window_bounds = array<i64: 128, 8>}, {transform_indices = @transform_2, window_bounds = array<i64: 8, 8>}]} {
    %c0 = arith.constant 0 : index
    %c0_0 = arith.constant 0 : index
    %0 = vector.load %arg2[%c0, %c0_0] : memref<8x128xf32, #tpu.memory_space<vmem>>, vector<8x128xf32>
    %c0_1 = arith.constant 0 : index
    %c0_2 = arith.constant 0 : index
    %1 = vector.load %arg3[%c0_1, %c0_2] : memref<128x8xf32, #tpu.memory_space<vmem>>, vector<128x8xf32>
    %cst = arith.constant dense<0.000000e+00> : vector<8x8xf32>
    %2 = tpu.matmul %0, %1, %cst {dimension_numbers = #tpu.dot_dimension_numbers<[1], [0], [0], [1], [0, 0, 1, 1], [], []>} : vector<8x128xf32>, vector<128x8xf32>, vector<8x8xf32> -> vector<8x8xf32>
    %c0_3 = arith.constant 0 : index
    %c0_4 = arith.constant 0 : index
    %3 = vector.load %arg4[%c0_3, %c0_4] : memref<8x8xf32, #tpu.memory_space<vmem>>, vector<8x8xf32>
    tpu.vector_store %arg4[%c0_3, %c0_4], %2 {strides = array<i32>} : memref<8x8xf32, #tpu.memory_space<vmem>>, vector<8x8xf32>,
    return
  }
  func.func @transform_0(%arg0: i32, %arg1: i32) -> (i32, i32) {
    %c0_i32 = arith.constant 0 : i32
    %c0_i32_0 = arith.constant 0 : i32
    return %arg0, %c0_i32 : i32, i32
  }
  func.func @transform_1(%arg0: i32, %arg1: i32) -> (i32, i32) {
    %c0_i32 = arith.constant 0 : i32
    %c0_i32_0 = arith.constant 0 : i32
    return %c0_i32, %arg1 : i32, i32
  }
  func.func @transform_2(%arg0: i32, %arg1: i32) -> (i32, i32) {
    %c0_i32 = arith.constant 0 : i32
    return %arg0, %arg1 : i32, i32
  }
}

</mosaic_0001>

<bundles_post_ra>
// kernel: tpu_custom_call.1
= control target key start
LH: loop header
LB: loop body
LE: loop exit
PB: predicated region body
PF: predicated region fallthrough
CT: control target
= control target key end

     0   :  { %v219_v3 = vmov 0.0|0.0   ;;  %vm220_vm0 = vmmov 0   ;;  %v221_v6 = vmov 0.0   ;;  %s301_s0 = inlined_call_operand.vmem [shape: f32[8,128], index: 0, kind: input, shape index: {}]   ;;  %s302_s1 = inlined_call_operand.vmem [shape: f32[128,8], index: 1, kind: input, shape index: {}]   ;;  %s303_s2 = inlined_call_operand.hbm [shape: f32[8,8], index: 2, kind: output, shape index: {}]  }
   0x1   :  { %v13_v0 = vld [vmem:[%s302_s1] sm:$0xff]  ;;  %v14_v1 = vld [vmem:[%s302_s1 + $0x8] sm:$0xff]  ;;  %v15_v2 = vld [vmem:[%s302_s1 + $0x10] sm:$0xff]  ;;  %167 = vmatprep.subr.bf16.mxu0 %v219_v3  ;;  %164 = vmatprep.mubr.msk.f32.mxu0 %vm220_vm0, %v221_v6 }
   0x2   :  { %v168_v4 = vpack.c.bf16 %v14_v1, %v13_v0  ;;  %v16_v5 = vld [vmem:[%s302_s1 + $0x18] sm:$0xff]  ;;  %v17_v8 = vld [vmem:[%s302_s1 + $0x20] sm:$0xff]  ;;  %v18_v9 = vld [vmem:[%s302_s1 + $0x28] sm:$0xff] }
   0x3   :  { %v171_v7 = vpack.c.bf16 %v16_v5, %v15_v2 }
   0x4   :  { %169 = vmatpush3.bf16.msra.mxu0 %v168_v4 }
   0x5   :  { %170 = vmatprep.subr.bf16.mxu0 %v219_v3 }
   0x6   :  { %7 = vsyncpa [#allocation3], 0  ;;  %v174_v10 = vpack.c.bf16 %v18_v9, %v17_v8  ;;  %v19_v11 = vld [vmem:[%s302_s1 + $0x30] sm:$0xff]  ;;  %v20_v12 = vld [vmem:[%s302_s1 + $0x38] sm:$0xff]  ;;  %s222_s15 = smov [#allocation2]   ;;  %vm99_vm1 = vcmask 64512  }
   0x7   :  { %v177_v13 = vpack.c.bf16 %v20_v12, %v19_v11  ;;  %v21_v14 = vld [vmem:[%s302_s1 + $0x40] sm:$0xff]  ;;  %v22_v15 = vld [vmem:[%s302_s1 + $0x48] sm:$0xff]  ;;  %v23_v17 = vld [vmem:[%s302_s1 + $0x50] sm:$0xff]  ;;  %s107_s16 = sshll.u32 %s222_s15, 4  ;;  %s108_s16 = int_to_ptr.vmem [resolvable:$true] %s107_s16 }
   0x8   :  { %172 = vmatpush3.bf16.msra.mxu0 %v171_v7  ;;  %v180_v16 = vpack.c.bf16 %v22_v15, %v21_v14  ;;  %v24_v18 = vld [vmem:[%s302_s1 + $0x58] sm:$0xff]  ;;  %v25_v20 = vld [vmem:[%s302_s1 + $0x60] sm:$0xff]  ;;  %v26_v21 = vld [vmem:[%s302_s1 + $0x68] sm:$0xff]  ;;  %s195_s17 = scalar_lea.vmem %s108_s16, 128  ;;  %p200_p1 = scmp.lt.s32.totalorder %s108_s16, %s108_s16 }
   0x9   :  { %173 = vmatprep.subr.bf16.mxu0 %v219_v3  ;;  %v183_v19 = vpack.c.bf16 %v24_v18, %v23_v17  ;;  %v186_v22 = vpack.c.bf16 %v26_v21, %v25_v20  ;;  %v27_v23 = vld [vmem:[%s302_s1 + $0x70] sm:$0xff]  ;;  %v28_v24 = vld [vmem:[%s302_s1 + $0x78] sm:$0xff]  ;;  %v12_v26 = vld [vmem:[%s301_s0] sm:$0xff]  ;;  %p196_p0 = scmp.ne.s32.totalorder %s108_s16, %s195_s17  ;;  %p201_p2 = scmp.lt.s32.totalorder %s195_s17, %s195_s17 }
   0xa   :  { %v189_v25 = vpack.c.bf16 %v28_v24, %v27_v23 }
   0xb   :  { %p202_p3 = por %p201_p2, %p200_p1 }
   0xc   :  { %175 = vmatpush3.bf16.msra.mxu0 %v174_v10 }
   0xd   :  { %176 = vmatprep.subr.bf16.mxu0 %v219_v3  ;;  %p203_p4 = pnand %p202_p3, %p196_p0 }
  0x10   :  { %178 = vmatpush3.bf16.msra.mxu0 %v177_v13 }
  0x11   :  { %179 = vmatprep.subr.bf16.mxu0 %v219_v3 }
  0x14   :  { %181 = vmatpush3.bf16.msra.mxu0 %v180_v16 }
  0x15   :  { %182 = vmatprep.subr.bf16.mxu0 %v219_v3 }
  0x18   :  { %184 = vmatpush3.bf16.msra.mxu0 %v183_v19 }
  0x19   :  { %185 = vmatprep.subr.bf16.mxu0 %v219_v3 }
  0x1c   :  { %187 = vmatpush3.bf16.msra.mxu0 %v186_v22 }
  0x1d   :  { %188 = vmatprep.subr.bf16.mxu0 %v219_v3 }
  0x20   :  { %190 = vmatpush3.bf16.msra.mxu0 %v189_v25 }
  0x23   :  { %165 = vmatmul.mubr.f32.vlgmr.msra.gmra.mrb[0].mxu0 %v12_v26 }
  0xf6   :  { %v95_v27 = vpop.f32.mrb[0].mxu0 }
  0xf7   :  { %100 = vst.msk [vmem:[#allocation2] sm:$0xff] %vm99_vm1, %v95_v27  ;;  %v166_v28 = vpop.f32.mrb[1].mxu0 }
  0xf8   :  { %206 = shalt.err (!%p203_p4)
}
  0xf9   :  { %s207_s19 = scalar_lea.hbm %s303_s2, 128 }
  0xfa   :  { %p208_p5 = scmp.ne.s32.totalorder %s303_s2, %s207_s19  ;;  %p211_p6 = scmp.lt.u32.totalorder %s207_s19, %s303_s2 }
  0xfc   :  { %p213_p7 = pnand %p211_p6, %p208_p5 }
  0xfe   :  { %216 = shalt.err (!%p213_p7)
}
  0xff   :  { %110 = dma.vmem_to_hbm [thread:$0]  %s108_s16, 128, %s303_s2, [#allocation3]  }
 0x100   :  { %217 = dma.done.wait [#allocation3], 128  }
 0x101   :  { %218 = vsyncadd [#allocation3], 4294967168 }
 0x102   :  { %114 = vsyncpa [#allocation3], 1 }

</bundles_post_ra>
